<compile_context>
chip_gen: v5e
topology: v5e:2x2
jax: 0.10.0
libtpu: 0.0.40
codegen_flags: <defaults>
</compile_context>

<pallas_src>
import functools

import jax
import jax.numpy as jnp
from jax.experimental import pallas as pl
from jax.experimental.pallas import tpu as pltpu

# Logical dims of the PyTorch module.
IN_F, HID_F, OUT_F = 784, 300, 10
# Lane-padded (multiple-of-128) dims used inside the kernel.
IN_P, HID_P, OUT_P = 896, 384, 128


def three_layer_kernel(x_ref, w1_ref, w2_ref, o_ref):
    # Layer 1: [TB, 896]bf16 @ [896, 384]bf16 -> [TB, 384] f32 accumulator (MXU).
    h = jnp.dot(x_ref[...], w1_ref[...], preferred_element_type=jnp.float32)
    # Sigmoid on the f32 accumulator (v5e-safe: elementwise stays f32).
    # tanh half-angle form: stable and runs on the otherwise-idle EUP slot.
    s = 0.5 * (jnp.tanh(0.5 * h) + 1.0)
    # Layer 2: downcast activations to bf16 for the MXU, accumulate in f32.
    o_ref[...] = jnp.dot(s.astype(jnp.bfloat16), w2_ref[...],
                         preferred_element_type=jnp.float32).astype(o_ref.dtype)


def _round_up(n, m):
    return (n + m - 1) // m * m


def _pad_to(a, shape):
    return jnp.pad(a, [(0, t - s) for s, t in zip(a.shape, shape)])


@functools.partial(jax.jit, static_argnames=("tb",))
def three_layer_forward(x, w1_t, w2_t, *, tb=512):
    """x: [B, 784] f32, w1_t: [784, 300] f32, w2_t: [300, 10] f32 -> [B, 10] f32.

    Operands are zero-padded to lane-dense shapes and cast to bf16; the batch
    axis is tiled (tb rows per grid step, marked "parallel") while the weights
    use a constant index_map and stay resident in VMEM across batch tiles.
    VMEM per step at tb=512 is ~3 MiB (double-buffered), safely under the
    32 MiB scoped default on every generation including v7x.
    """
    B = x.shape[0]
    tb = min(tb, _round_up(B, 8))     # small batches: single tile, 8-aligned
    Bp = _round_up(B, tb)

    x_p = _pad_to(x, (Bp, IN_P)).astype(jnp.bfloat16)
    w1_p = _pad_to(w1_t, (IN_P, HID_P)).astype(jnp.bfloat16)
    w2_p = _pad_to(w2_t, (HID_P, OUT_P)).astype(jnp.bfloat16)

    out_p = pl.pallas_call(
        three_layer_kernel,
        out_shape=jax.ShapeDtypeStruct((Bp, OUT_P), jnp.float32),
        grid_spec=pltpu.PrefetchScalarGridSpec(
            num_scalar_prefetch=0,
            grid=(Bp // tb,),
            in_specs=[
                pl.BlockSpec((tb, IN_P), lambda i: (i, 0)),     # activations stream
                pl.BlockSpec((IN_P, HID_P), lambda i: (0, 0)),  # w1 resident
                pl.BlockSpec((HID_P, OUT_P), lambda i: (0, 0)),  # w2 resident
            ],
            out_specs=pl.BlockSpec((tb, OUT_P), lambda i: (i, 0)),
        ),
        compiler_params=pltpu.CompilerParams(
            dimension_semantics=("parallel",),       # v7x: shard tiles across TCs
            vmem_limit_bytes=32 * 1024 * 1024,
        ),
    )(x_p, w1_p, w2_p)

    return out_p[:B, :OUT_F]


def init_params(key, init="uniform"):
    """Deterministic parameter init mirroring ThreeLayer.__init__.

    PyTorch stores Linear weights as [out_features, in_features]; we keep the
    same logical values but pre-transpose to [in, out] for the kernel layout.
    """
    k1, k2 = jax.random.split(key)
    if init == "uniform":
        w1 = jax.random.uniform(k1, (HID_F, IN_F), jnp.float32, minval=-1.0, maxval=1.0)
        w2 = jax.random.uniform(k2, (OUT_F, HID_F), jnp.float32, minval=-1.0, maxval=1.0)
    elif init == "zero":
        w1 = jnp.zeros((HID_F, IN_F), jnp.float32)
        w2 = jnp.zeros((OUT_F, HID_F), jnp.float32)
    else:
        raise ValueError("Invalid initialization")
    return w1.T, w2.T  # [784, 300], [300, 10]


if __name__ == "__main__":
    key = jax.random.PRNGKey(0)
    kx, kp = jax.random.split(key)

    B = 8
    x = jax.random.normal(kx, (B, IN_F), jnp.float32)
    w1_t, w2_t = init_params(kp, init="uniform")

    out = jax.block_until_ready(three_layer_forward(x, w1_t, w2_t))

    # Reference in plain JAX with the same bf16 operand quantization.
    q = lambda a: a.astype(jnp.bfloat16).astype(jnp.float32)
    h_ref = q(x) @ q(w1_t)
    s_ref = jax.nn.sigmoid(h_ref)
    ref = q(s_ref) @ q(w2_t)

    assert out.shape == (B, OUT_F)
    assert jnp.allclose(out, ref, atol=5e-3, rtol=5e-3), float(
        jnp.max(jnp.abs(out - ref)))

    print("KERNEL_OK")
</pallas_src>

<mosaic_0001>
module attributes {stable_mosaic.version = 11 : i64} {
  func.func @three_layer_kernel(%arg0: i32, %arg1: memref<8x896xbf16, #tpu.memory_space<vmem>>, %arg2: memref<896x384xbf16, #tpu.memory_space<vmem>>, %arg3: memref<384x128xbf16, #tpu.memory_space<vmem>>, %arg4: memref<8x128xf32, #tpu.memory_space<vmem>>) attributes {dimension_semantics = [#tpu.dimension_semantics<parallel>], iteration_bounds = array<i64: 1>, scalar_prefetch = 0 : i64, scratch_operands = 0 : i64, tpu.core_type = #tpu.core_type<tc>, window_params = [{transform_indices = @transform_0, window_bounds = array<i64: 8, 896>}, {pipeline_mode = #tpu.pipeline_mode<synchronous>, transform_indices = @transform_1, window_bounds = array<i64: 896, 384>}, {pipeline_mode = #tpu.pipeline_mode<synchronous>, transform_indices = @transform_2, window_bounds = array<i64: 384, 128>}, {transform_indices = @transform_3, window_bounds = array<i64: 8, 128>}]} {
    %c0 = arith.constant 0 : index
    %c0_0 = arith.constant 0 : index
    %0 = vector.load %arg1[%c0, %c0_0] : memref<8x896xbf16, #tpu.memory_space<vmem>>, vector<8x896xbf16>
    %c0_1 = arith.constant 0 : index
    %c0_2 = arith.constant 0 : index
    %1 = vector.load %arg2[%c0_1, %c0_2] : memref<896x384xbf16, #tpu.memory_space<vmem>>, vector<896x384xbf16>
    %cst = arith.constant dense<0.000000e+00> : vector<8x384xf32>
    %2 = tpu.matmul %0, %1, %cst {dimension_numbers = #tpu.dot_dimension_numbers<[1], [0], [0], [1], [0, 0, 1, 1], [], []>} : vector<8x896xbf16>, vector<896x384xbf16>, vector<8x384xf32> -> vector<8x384xf32>
    %cst_3 = arith.constant 5.000000e-01 : f32
    %3 = vector.broadcast %cst_3 : f32 to vector<8x384xf32>
    %4 = arith.mulf %3, %2 : vector<8x384xf32>
    %5 = math.tanh %4 : vector<8x384xf32>
    %cst_4 = arith.constant 1.000000e+00 : f32
    %6 = vector.broadcast %cst_4 : f32 to vector<8x384xf32>
    %7 = arith.addf %5, %6 : vector<8x384xf32>
    %cst_5 = arith.constant 5.000000e-01 : f32
    %8 = vector.broadcast %cst_5 : f32 to vector<8x384xf32>
    %9 = arith.mulf %8, %7 : vector<8x384xf32>
    %10 = arith.truncf %9 : vector<8x384xf32> to vector<8x384xbf16>
    %c0_6 = arith.constant 0 : index
    %c0_7 = arith.constant 0 : index
    %11 = vector.load %arg3[%c0_6, %c0_7] : memref<384x128xbf16, #tpu.memory_space<vmem>>, vector<384x128xbf16>
    %cst_8 = arith.constant dense<0.000000e+00> : vector<8x128xf32>
    %12 = tpu.matmul %10, %11, %cst_8 {dimension_numbers = #tpu.dot_dimension_numbers<[1], [0], [0], [1], [0, 0, 1, 1], [], []>} : vector<8x384xbf16>, vector<384x128xbf16>, vector<8x128xf32> -> vector<8x128xf32>
    %c0_9 = arith.constant 0 : index
    %c0_10 = arith.constant 0 : index
    %13 = vector.load %arg4[%c0_9, %c0_10] : memref<8x128xf32, #tpu.memory_space<vmem>>, vector<8x128xf32>
    tpu.vector_store %arg4[%c0_9, %c0_10], %12 {strides = array<i32>} : memref<8x128xf32, #tpu.memory_space<vmem>>, vector<8x128xf32>,
    return
  }
  func.func @transform_0(%arg0: i32) -> (i32, i32) {
    %c0_i32 = arith.constant 0 : i32
    %c0_i32_0 = arith.constant 0 : i32
    return %arg0, %c0_i32 : i32, i32
  }
  func.func @transform_1(%arg0: i32) -> (i32, i32) {
    %c0_i32 = arith.constant 0 : i32
    %c0_i32_0 = arith.constant 0 : i32
    %c0_i32_1 = arith.constant 0 : i32
    return %c0_i32, %c0_i32_0 : i32, i32
  }
  func.func @transform_2(%arg0: i32) -> (i32, i32) {
    %c0_i32 = arith.constant 0 : i32
    %c0_i32_0 = arith.constant 0 : i32
    %c0_i32_1 = arith.constant 0 : i32
    return %c0_i32, %c0_i32_0 : i32, i32
  }
  func.func @transform_3(%arg0: i32) -> (i32, i32) {
    %c0_i32 = arith.constant 0 : i32
    %c0_i32_0 = arith.constant 0 : i32
    return %arg0, %c0_i32 : i32, i32
  }
}

</mosaic_0001>

<bundles_post_ra>
// kernel: three_layer_forward.1
= control target key start
LH: loop header
LB: loop body
LE: loop exit
PB: predicated region body
PF: predicated region fallthrough
CT: control target
= control target key end

     0   :  { %s3844_s0 = inlined_call_operand.vmem [shape: bf16[8,896], index: 0, kind: input, shape index: {}]   ;;  %s3845_s1 = inlined_call_operand.vmem [shape: bf16[896,384], index: 1, kind: input, shape index: {}]   ;;  %s3846_s2 = inlined_call_operand.vmem [shape: bf16[384,128], index: 2, kind: input, shape index: {}]   ;;  %s3847_s3 = inlined_call_operand.hbm [shape: f32[8,128], index: 3, kind: output, shape index: {}]  }
   0x1   :  { %v1786_v0 = vld [vmem:[%s3845_s1 + $0xa8] sm:$0xf]  ;;  %v2490_v1 = vld [vmem:[%s3845_s1 + $0xb0] sm:$0xf0]  ;;  %v1774_v9 = vld [vmem:[%s3845_s1 + $0x90] sm:$0xf] }
   0x2   :  { %v1978_v2 = vld [vmem:[%s3845_s1 + $0x228] sm:$0xf]  ;;  %v1787_v3 = vor.u32 %v2490_v1, %v1786_v0  ;;  %v2538_v4 = vld [vmem:[%s3845_s1 + $0x230] sm:$0xf0]  ;;  %v2487_v10 = vld [vmem:[%s3845_s1 + $0x98] sm:$0xf0] }
   0x3   :  { %v1882_v5 = vld [vmem:[%s3845_s1 + $0x168] sm:$0xf]  ;;  %v2514_v6 = vld [vmem:[%s3845_s1 + $0x170] sm:$0xf0]  ;;  %v1979_v7 = vor.u32 %v2538_v4, %v1978_v2  ;;  %v1966_v11 = vld [vmem:[%s3845_s1 + $0x210] sm:$0xf]  ;;  %v1775_v12 = vor.u32 %v2487_v10, %v1774_v9 }
   0x4   :  { %v1883_v8 = vor.u32 %v2514_v6, %v1882_v5  ;;  %1164 = vmatpush.bf16.msra.mxu0 %v1787_v3  ;;  %v2535_v13 = vld [vmem:[%s3845_s1 + $0x218] sm:$0xf0]  ;;  %v1870_v14 = vld [vmem:[%s3845_s1 + $0x150] sm:$0xf]  ;;  %v1762_v18 = vld [vmem:[%s3845_s1 + $0x78] sm:$0xf] }
   0x5   :  { %v2511_v15 = vld [vmem:[%s3845_s1 + $0x158] sm:$0xf0]  ;;  %1190 = vmatpush.bf16.msra.mxu2 %v1979_v7  ;;  %v1967_v16 = vor.u32 %v2535_v13, %v1966_v11  ;;  %v2484_v19 = vld [vmem:[%s3845_s1 + $0x80] sm:$0xf0]  ;;  %v1954_v20 = vld [vmem:[%s3845_s1 + $0x1f8] sm:$0xf] }
   0x6   :  { %1177 = vmatpush.bf16.msra.mxu1 %v1883_v8  ;;  %v1871_v17 = vor.u32 %v2511_v15, %v1870_v14  ;;  %v2532_v21 = vld [vmem:[%s3845_s1 + $0x200] sm:$0xf0]  ;;  %v1858_v22 = vld [vmem:[%s3845_s1 + $0x138] sm:$0xf]  ;;  %v2074_v24 = vld [vmem:[%s3845_s1 + $0x2e8] sm:$0xf]  ;;  %v1763_v26 = vor.u32 %v2484_v19, %v1762_v18 }
   0x7   :  { %v2508_v23 = vld [vmem:[%s3845_s1 + $0x140] sm:$0xf0]  ;;  %v2562_v25 = vld [vmem:[%s3845_s1 + $0x2f0] sm:$0xf0]  ;;  %v1750_v28 = vld [vmem:[%s3845_s1 + $0x60] sm:$0xf]  ;;  %v1955_v30 = vor.u32 %v2532_v21, %v1954_v20 }
   0x8   :  { %1165 = vmatpush.bf16.msra.mxu0 %v1775_v12  ;;  %v2075_v27 = vor.u32 %v2562_v25, %v2074_v24  ;;  %v2481_v29 = vld [vmem:[%s3845_s1 + $0x68] sm:$0xf0]  ;;  %v1859_v31 = vor.u32 %v2508_v23, %v1858_v22  ;;  %v1942_v32 = vld [vmem:[%s3845_s1 + $0x1e0] sm:$0xf]  ;;  %v2062_v34 = vld [vmem:[%s3845_s1 + $0x2d0] sm:$0xf] }
   0x9   :  { %1191 = vmatpush.bf16.msra.mxu2 %v1967_v16  ;;  %v2529_v33 = vld [vmem:[%s3845_s1 + $0x1e8] sm:$0xf0]  ;;  %v1846_v35 = vld [vmem:[%s3845_s1 + $0x120] sm:$0xf]  ;;  %v2559_v37 = vld [vmem:[%s3845_s1 + $0x2d8] sm:$0xf0]  ;;  %v1751_v39 = vor.u32 %v2481_v29, %v1750_v28 }
   0xa   :  { %1178 = vmatpush.bf16.msra.mxu1 %v1871_v17  ;;  %1203 = vmatpush.bf16.msra.mxu3 %v2075_v27  ;;  %v2505_v36 = vld [vmem:[%s3845_s1 + $0x128] sm:$0xf0]  ;;  %v2063_v38 = vor.u32 %v2559_v37, %v2062_v34  ;;  %v2050_v40 = vld [vmem:[%s3845_s1 + $0x2b8] sm:$0xf]  ;;  %v2556_v41 = vld [vmem:[%s3845_s1 + $0x2c0] sm:$0xf0]  ;;  %v1943_v42 = vor.u32 %v2529_v33, %v1942_v32 }
   0xb   :  { %v1847_v43 = vor.u32 %v2505_v36, %v1846_v35  ;;  %v1738_v44 = vld [vmem:[%s3845_s1 + $0x48] sm:$0xf]  ;;  %v2478_v45 = vld [vmem:[%s3845_s1 + $0x50] sm:$0xf0]  ;;  %v2051_v50 = vor.u32 %v2556_v41, %v2050_v40  ;;  %v2038_v51 = vld [vmem:[%s3845_s1 + $0x2a0] sm:$0xf] }
   0xc   :  { %1166 = vmatpush.bf16.msra.mxu0 %v1763_v26  ;;  %v1930_v46 = vld [vmem:[%s3845_s1 + $0x1c8] sm:$0xf]  ;;  %v2526_v47 = vld [vmem:[%s3845_s1 + $0x1d0] sm:$0xf0]  ;;  %v2553_v52 = vld [vmem:[%s3845_s1 + $0x2a8] sm:$0xf0]  ;;  %v1739_v53 = vor.u32 %v2478_v45, %v1738_v44 }
   0xd   :  { %1192 = vmatpush.bf16.msra.mxu2 %v1955_v30  ;;  %v1834_v48 = vld [vmem:[%s3845_s1 + $0x108] sm:$0xf]  ;;  %v2502_v49 = vld [vmem:[%s3845_s1 + $0x110] sm:$0xf0]  ;;  %v1931_v54 = vor.u32 %v2526_v47, %v1930_v46  ;;  %v1726_v56 = vld [vmem:[%s3845_s1 + $0x30] sm:$0xf]  ;;  %v2039_v62 = vor.u32 %v2553_v52, %v2038_v51 }
   0xe   :  { %1179 = vmatpush.bf16.msra.mxu1 %v1859_v31  ;;  %1204 = vmatpush.bf16.msra.mxu3 %v2063_v38  ;;  %v1835_v55 = vor.u32 %v2502_v49, %v1834_v48  ;;  %v2475_v57 = vld [vmem:[%s3845_s1 + $0x38] sm:$0xf0]  ;;  %v1918_v58 = vld [vmem:[%s3845_s1 + $0x1b0] sm:$0xf]  ;;  %v2026_v63 = vld [vmem:[%s3845_s1 + $0x288] sm:$0xf] }
   0xf   :  { %v2523_v59 = vld [vmem:[%s3845_s1 + $0x1b8] sm:$0xf0]  ;;  %v1822_v60 = vld [vmem:[%s3845_s1 + $0xf0] sm:$0xf]  ;;  %v2550_v0 = vld [vmem:[%s3845_s1 + $0x290] sm:$0xf0]  ;;  %v1727_v1 = vor.u32 %v2475_v57, %v1726_v56 }
  0x10   :  { %1167 = vmatpush.bf16.msra.mxu0 %v1751_v39  ;;  %v2499_v61 = vld [vmem:[%s3845_s1 + $0xf8] sm:$0xf0]  ;;  %v1919_v2 = vor.u32 %v2523_v59, %v1918_v58  ;;  %v1714_v4 = vld [vmem:[%s3845_s1 + $0x18] sm:$0xf]  ;;  %v2472_v5 = vld [vmem:[%s3845_s1 + $0x20] sm:$0xf0]  ;;  %v2027_v10 = vor.u32 %v2550_v0, %v2026_v63 }
  0x11   :  { %1193 = vmatpush.bf16.msra.mxu2 %v1943_v42  ;;  %v1823_v3 = vor.u32 %v2499_v61, %v1822_v60  ;;  %v1906_v6 = vld [vmem:[%s3845_s1 + $0x198] sm:$0xf]  ;;  %v2520_v7 = vld [vmem:[%s3845_s1 + $0x1a0] sm:$0xf0]  ;;  %v2014_v11 = vld [vmem:[%s3845_s1 + $0x270] sm:$0xf]  ;;  %v1715_v13 = vor.u32 %v2472_v5, %v1714_v4 }
  0x12   :  { %1180 = vmatpush.bf16.msra.mxu1 %v1847_v43  ;;  %1205 = vmatpush.bf16.msra.mxu3 %v2051_v50  ;;  %v1810_v8 = vld [vmem:[%s3845_s1 + $0xd8] sm:$0xf]  ;;  %v2496_v9 = vld [vmem:[%s3845_s1 + $0xe0] sm:$0xf0]  ;;  %v2547_v12 = vld [vmem:[%s3845_s1 + $0x278] sm:$0xf0]  ;;  %v1907_v16 = vor.u32 %v2520_v7, %v1906_v6 }
  0x13   :  { %v1702_v14 = vld [vmem:[%s3845_s1] sm:$0xf]  ;;  %v2469_v15 = vld [vmem:[%s3845_s1 + $0x8] sm:$0xf0]  ;;  %v1811_v17 = vor.u32 %v2496_v9, %v1810_v8  ;;  %v2170_v20 = vld [vmem:[%s3845_s1 + $0x3a8] sm:$0xf]  ;;  %v2015_v24 = vor.u32 %v2547_v12, %v2014_v11 }
  0x14   :  { %1168 = vmatpush.bf16.msra.mxu0 %v1739_v53  ;;  %v1894_v18 = vld [vmem:[%s3845_s1 + $0x180] sm:$0xf]  ;;  %v2517_v19 = vld [vmem:[%s3845_s1 + $0x188] sm:$0xf0]  ;;  %v2586_v21 = vld [vmem:[%s3845_s1 + $0x3b0] sm:$0xf0]  ;;  %v1703_v28 = vor.u32 %v2469_v15, %v1702_v14 }
  0x15   :  { %1194 = vmatpush.bf16.msra.mxu2 %v1931_v54  ;;  %v2362_v22 = vld [vmem:[%s3845_s1 + $0x528] sm:$0xf]  ;;  %v2634_v23 = vld [vmem:[%s3845_s1 + $0x530] sm:$0xf0]  ;;  %v1798_v25 = vld [vmem:[%s3845_s1 + $0xc0] sm:$0xf]  ;;  %v1895_v32 = vor.u32 %v2517_v19, %v1894_v18  ;;  %v2171_v33 = vor.u32 %v2586_v21, %v2170_v20 }
  0x16   :  { %1181 = vmatpush.bf16.msra.mxu1 %v1835_v55  ;;  %1206 = vmatpush.bf16.msra.mxu3 %v2039_v62  ;;  %v2493_v26 = vld [vmem:[%s3845_s1 + $0xc8] sm:$0xf0]  ;;  %v2266_v27 = vld [vmem:[%s3845_s1 + $0x468] sm:$0xf]  ;;  %v2610_v29 = vld [vmem:[%s3845_s1 + $0x470] sm:$0xf0]  ;;  %v2363_v35 = vor.u32 %v2634_v23, %v2362_v22 }
  0x17   :  { %v2002_v30 = vld [vmem:[%s3845_s1 + $0x258] sm:$0xf]  ;;  %v2544_v31 = vld [vmem:[%s3845_s1 + $0x260] sm:$0xf0]  ;;  %v2158_v34 = vld [vmem:[%s3845_s1 + $0x390] sm:$0xf]  ;;  %v1799_v36 = vor.u32 %v2493_v26, %v1798_v25  ;;  %v2267_v40 = vor.u32 %v2610_v29, %v2266_v27 }
  0x18   :  { %1169 = vmatpush.bf16.msra.mxu0 %v1727_v1  ;;  %v2583_v37 = vld [vmem:[%s3845_s1 + $0x398] sm:$0xf0]  ;;  %v2350_v38 = vld [vmem:[%s3845_s1 + $0x510] sm:$0xf]  ;;  %v2003_v41 = vor.u32 %v2544_v31, %v2002_v30  ;;  %v16_v43 = vld [vmem:[%s3844_s0 + $0x8] sm:$0xff] }
  0x19   :  { %1195 = vmatpush.bf16.msra.mxu2 %v1919_v2  ;;  %v2631_v39 = vld [vmem:[%s3845_s1 + $0x518] sm:$0xf0]  ;;  %v2254_v42 = vld [vmem:[%s3845_s1 + $0x450] sm:$0xf]  ;;  %v1990_v45 = vld [vmem:[%s3845_s1 + $0x240] sm:$0xf]  ;;  %v249_v47 = vunpack.c.l.b16 %v16_v43  ;;  %v2159_v48 = vor.u32 %v2583_v37, %v2158_v34  ;;  %v250_v58 = vunpack.c.h.b16 %v16_v43 }
  0x1a   :  { %1182 = vmatpush.bf16.msra.mxu1 %v1823_v3  ;;  %1207 = vmatpush.bf16.msra.mxu3 %v2027_v10  ;;  %v2607_v44 = vld [vmem:[%s3845_s1 + $0x458] sm:$0xf0]  ;;  %v2541_v46 = vld [vmem:[%s3845_s1 + $0x248] sm:$0xf0]  ;;  %v2351_v49 = vor.u32 %v2631_v39, %v2350_v38  ;;  %v1788_v51 = vld [vmem:[%s3845_s1 + $0xb4] sm:$0xf0] }
  0x1b   :  { %v2489_v50 = vld [vmem:[%s3845_s1 + $0xac] sm:$0xf]  ;;  %v15_v52 = vld [vmem:[%s3844_s0] sm:$0xff]  ;;  %v2146_v53 = vld [vmem:[%s3845_s1 + $0x378] sm:$0xf]  ;;  %v2960_v55 = vpack.c.b16 %v249_v47, %v249_v47  ;;  %v2255_v59 = vor.u32 %v2607_v44, %v2254_v42  ;;  %v1991_v62 = vor.u32 %v2541_v46, %v1990_v45  ;;  %v2992_v10 = vpack.c.b16 %v250_v58, %v250_v58 }
  0x1c   :  { %1170 = vmatpush.bf16.msra.mxu0 %v1715_v13  ;;  %v2580_v54 = vld [vmem:[%s3845_s1 + $0x380] sm:$0xf0]  ;;  %v247_v56 = vunpack.c.l.b16 %v15_v52  ;;  %v248_v57 = vunpack.c.h.b16 %v15_v52  ;;  %v2338_v60 = vld [vmem:[%s3845_s1 + $0x4f8] sm:$0xf]  ;;  %v1791_v1 = vor.u32 %v2489_v50, %v1788_v51  ;;  %v2486_v5 = vld [vmem:[%s3845_s1 + $0x94] sm:$0xf] }
  0x1d   :  { %1196 = vmatpush.bf16.msra.mxu2 %v1907_v16  ;;  %v2628_v61 = vld [vmem:[%s3845_s1 + $0x500] sm:$0xf0]  ;;  %v2242_v63 = vld [vmem:[%s3845_s1 + $0x438] sm:$0xf]  ;;  %v2147_v4 = vor.u32 %v2580_v54, %v2146_v53  ;;  %v1776_v6 = vld [vmem:[%s3845_s1 + $0x9c] sm:$0xf0] }
  0x1e   :  { %1183 = vmatpush.bf16.msra.mxu1 %v1811_v17  ;;  %1208 = vmatpush.bf16.msra.mxu3 %v2015_v24  ;;  %v2604_v0 = vld [vmem:[%s3845_s1 + $0x440] sm:$0xf0]  ;;  %v2975_v2 = vpack.c.b16 %v247_v56, %v247_v56  ;;  %v2977_v3 = vpack.c.b16 %v248_v57, %v248_v57  ;;  %v2339_v7 = vor.u32 %v2628_v61, %v2338_v60  ;;  %v2134_v8 = vld [vmem:[%s3845_s1 + $0x360] sm:$0xf]  ;;  %v2577_v9 = vld [vmem:[%s3845_s1 + $0x368] sm:$0xf0] }
  0x1f   :  { %v2243_v11 = vor.u32 %v2604_v0, %v2242_v63  ;;  %v2326_v12 = vld [vmem:[%s3845_s1 + $0x4e0] sm:$0xf]  ;;  %v2625_v13 = vld [vmem:[%s3845_s1 + $0x4e8] sm:$0xf0]  ;;  %v1779_v16 = vor.u32 %v2486_v5, %v1776_v6  ;;  %v2135_v17 = vor.u32 %v2577_v9, %v2134_v8  ;;  %v2483_v18 = vld [vmem:[%s3845_s1 + $0x7c] sm:$0xf] }
  0x20   :  { %1171 = vmatpush.bf16.msra.mxu0 %v1703_v28  ;;  %v2230_v14 = vld [vmem:[%s3845_s1 + $0x420] sm:$0xf]  ;;  %v2601_v15 = vld [vmem:[%s3845_s1 + $0x428] sm:$0xf0]  ;;  %v1764_v19 = vld [vmem:[%s3845_s1 + $0x84] sm:$0xf0]  ;;  %v2327_v20 = vor.u32 %v2625_v13, %v2326_v12 }
  0x21   :  { %1197 = vmatpush.bf16.msra.mxu2 %v1895_v32  ;;  %v2122_v21 = vld [vmem:[%s3845_s1 + $0x348] sm:$0xf]  ;;  %v2574_v22 = vld [vmem:[%s3845_s1 + $0x350] sm:$0xf0]  ;;  %v2231_v23 = vor.u32 %v2601_v15, %v2230_v14  ;;  %v1767_v28 = vor.u32 %v2483_v18, %v1764_v19  ;;  %v2480_v30 = vld [vmem:[%s3845_s1 + $0x64] sm:$0xf] }
  0x22   :  { %1184 = vmatpush.bf16.msra.mxu1 %v1799_v36  ;;  %1209 = vmatpush.bf16.msra.mxu3 %v2003_v41  ;;  %v2314_v24 = vld [vmem:[%s3845_s1 + $0x4c8] sm:$0xf]  ;;  %v2622_v25 = vld [vmem:[%s3845_s1 + $0x4d0] sm:$0xf0]  ;;  %v2123_v29 = vor.u32 %v2574_v22, %v2122_v21  ;;  %v1752_v31 = vld [vmem:[%s3845_s1 + $0x6c] sm:$0xf0] }
  0x23   :  { %1172 = vmatmul.bf16.vlgmr.msra.gmra.mxu0 %v2975_v2  ;;  %v2218_v26 = vld [vmem:[%s3845_s1 + $0x408] sm:$0xf]  ;;  %v2598_v27 = vld [vmem:[%s3845_s1 + $0x410] sm:$0xf0]  ;;  %v2315_v32 = vor.u32 %v2622_v25, %v2314_v24  ;;  %v2571_v34 = vld [vmem:[%s3845_s1 + $0x338] sm:$0xf0] }
  0x24   :  { %1216 = vmatpush.bf16.msrb.mxu0 %v2171_v33  ;;  %1198 = vmatmul.bf16.vlgmr.msra.gmra.mxu2 %v2960_v55  ;;  %v2110_v33 = vld [vmem:[%s3845_s1 + $0x330] sm:$0xf]  ;;  %v2619_v37 = vld [vmem:[%s3845_s1 + $0x4b8] sm:$0xf0]  ;;  %v2477_v42 = vld [vmem:[%s3845_s1 + $0x4c] sm:$0xf] }
  0x25   :  { %1242 = vmatpush.bf16.msrb.mxu2 %v2363_v35  ;;  %1185 = vmatmul.bf16.vlgmr.msra.gmra.mxu1 %v2977_v3  ;;  %v2219_v35 = vor.u32 %v2598_v27, %v2218_v26  ;;  %v2302_v36 = vld [vmem:[%s3845_s1 + $0x4b0] sm:$0xf]  ;;  %v2595_v39 = vld [vmem:[%s3845_s1 + $0x3f8] sm:$0xf0]  ;;  %v2111_v41 = vor.u32 %v2571_v34, %v2110_v33  ;;  %v1740_v43 = vld [vmem:[%s3845_s1 + $0x54] sm:$0xf0] }
  0x26   :  { %1229 = vmatpush.bf16.msrb.mxu1 %v2267_v40  ;;  %1210 = vmatpush.bf16.msra.mxu3 %v1991_v62  ;;  %v2206_v38 = vld [vmem:[%s3845_s1 + $0x3f0] sm:$0xf]  ;;  %v1755_v40 = vor.u32 %v2480_v30, %v1752_v31  ;;  %v2303_v44 = vor.u32 %v2619_v37, %v2302_v36  ;;  %v2098_v45 = vld [vmem:[%s3845_s1 + $0x318] sm:$0xf]  ;;  %v2568_v46 = vld [vmem:[%s3845_s1 + $0x320] sm:$0xf0]  ;;  %v1743_v52 = vor.u32 %v2477_v42, %v1740_v43 }
  0x27   :  { %v2207_v47 = vor.u32 %v2595_v39, %v2206_v38  ;;  %v2194_v50 = vld [vmem:[%s3845_s1 + $0x3d8] sm:$0xf]  ;;  %v2592_v51 = vld [vmem:[%s3845_s1 + $0x3e0] sm:$0xf0]  ;;  %v2086_v53 = vld [vmem:[%s3845_s1 + $0x300] sm:$0xf]  ;;  %v2099_v56 = vor.u32 %v2568_v46, %v2098_v45 }
  0x28   :  { %1217 = vmatpush.bf16.msrb.mxu0 %v2159_v48  ;;  %v2290_v48 = vld [vmem:[%s3845_s1 + $0x498] sm:$0xf]  ;;  %v2565_v54 = vld [vmem:[%s3845_s1 + $0x308] sm:$0xf0]  ;;  %v2474_v57 = vld [vmem:[%s3845_s1 + $0x34] sm:$0xf]  ;;  %v2195_v0 = vor.u32 %v2592_v51, %v2194_v50 }
  0x29   :  { %1243 = vmatpush.bf16.msrb.mxu2 %v2351_v49  ;;  %1211 = vmatmul.bf16.vlgmr.msra.gmra.mxu3 %v2992_v10  ;;  %v2616_v49 = vld [vmem:[%s3845_s1 + $0x4a0] sm:$0xf0]  ;;  %v1728_v58 = vld [vmem:[%s3845_s1 + $0x3c] sm:$0xf0]  ;;  %v2613_v62 = vld [vmem:[%s3845_s1 + $0x488] sm:$0xf0]  ;;  %v2087_v12 = vor.u32 %v2565_v54, %v2086_v53 }
  0x2a   :  { %1230 = vmatpush.bf16.msrb.mxu1 %v2255_v59  ;;  %1255 = vmatpush.bf16.msrb.mxu3 %v1791_v1  ;;  %v17_v59 = vld [vmem:[%s3844_s0 + $0x10] sm:$0xff]  ;;  %v2291_v60 = vor.u32 %v2616_v49, %v2290_v48  ;;  %v2278_v61 = vld [vmem:[%s3845_s1 + $0x480] sm:$0xf]  ;;  %v18_v63 = vld [vmem:[%s3844_s0 + $0x18] sm:$0xf] }
  0x2b   :  { %v2513_v1 = vld [vmem:[%s3845_s1 + $0x16c] sm:$0xf]  ;;  %v2182_v5 = vld [vmem:[%s3845_s1 + $0x3c0] sm:$0xf]  ;;  %v251_v8 = vunpack.c.l.b16 %v17_v59  ;;  %v253_v13 = vunpack.c.l.b16 %v18_v63  ;;  %v1980_v15 = vld [vmem:[%s3845_s1 + $0x234] sm:$0xf0]  ;;  %v252_v18 = vunpack.c.h.b16 %v17_v59 }
  0x2c   :  { %1218 = vmatpush.bf16.msrb.mxu0 %v2147_v4  ;;  %v1884_v4 = vld [vmem:[%s3845_s1 + $0x174] sm:$0xf0]  ;;  %v2589_v6 = vld [vmem:[%s3845_s1 + $0x3c8] sm:$0xf0]  ;;  %v2471_v19 = vld [vmem:[%s3845_s1 + $0x1c] sm:$0xf] }
  0x2d   :  { %1244 = vmatpush.bf16.msrb.mxu2 %v2339_v7  ;;  %v1731_v7 = vor.u32 %v2474_v57, %v1728_v58  ;;  %v2561_v9 = vld [vmem:[%s3845_s1 + $0x2ec] sm:$0xf]  ;;  %v2183_v21 = vor.u32 %v2589_v6, %v2182_v5  ;;  %v2510_v22 = vld [vmem:[%s3845_s1 + $0x154] sm:$0xf]  ;;  %v3140_v26 = vpack.c.b16 %v251_v8, %v251_v8  ;;  %v3156_v34 = vpack.c.b16 %v252_v18, %v252_v18  ;;  %v2468_v36 = vld [vmem:[%s3845_s1 + $0x4] sm:$0xf] }
  0x2e   :  { %1231 = vmatpush.bf16.msrb.mxu1 %v2243_v11  ;;  %1256 = vmatpush.bf16.msrb.mxu3 %v1779_v16  ;;  %v2076_v11 = vld [vmem:[%s3845_s1 + $0x2f4] sm:$0xf0]  ;;  %v2537_v14 = vld [vmem:[%s3845_s1 + $0x22c] sm:$0xf]  ;;  %v2279_v16 = vor.u32 %v2613_v62, %v2278_v61  ;;  %v2558_v27 = vld [vmem:[%s3845_s1 + $0x2d4] sm:$0xf] }
  0x2f   :  { %v2079_v24 = vor.u32 %v2561_v9, %v2076_v11  ;;  %v1983_v25 = vor.u32 %v2537_v14, %v1980_v15  ;;  %v2534_v31 = vld [vmem:[%s3845_s1 + $0x214] sm:$0xf]  ;;  %v1704_v37 = vld [vmem:[%s3845_s1 + $0xc] sm:$0xf0]  ;;  %v1860_v38 = vld [vmem:[%s3845_s1 + $0x144] sm:$0xf0] }
  0x30   :  { %1219 = vmatpush.bf16.msrb.mxu0 %v2135_v17  ;;  %v1887_v17 = vor.u32 %v2513_v1, %v1884_v4  ;;  %v2585_v39 = vld [vmem:[%s3845_s1 + $0x3ac] sm:$0xf]  ;;  %v2555_v43 = vld [vmem:[%s3845_s1 + $0x2bc] sm:$0xf]  ;;  %v1707_v45 = vor.u32 %v2468_v36, %v1704_v37  ;;  %v2504_v50 = vld [vmem:[%s3845_s1 + $0x124] sm:$0xf] }
  0x31   :  { %1245 = vmatpush.bf16.msrb.mxu2 %v2327_v20  ;;  %v1716_v20 = vld [vmem:[%s3845_s1 + $0x24] sm:$0xf0]  ;;  %v2531_v46 = vld [vmem:[%s3845_s1 + $0x1fc] sm:$0xf]  ;;  %v1848_v51 = vld [vmem:[%s3845_s1 + $0x12c] sm:$0xf0] }
  0x32   :  { %1232 = vmatpush.bf16.msrb.mxu1 %v2231_v23  ;;  %1257 = vmatpush.bf16.msrb.mxu3 %v1767_v28  ;;  %v1872_v23 = vld [vmem:[%s3845_s1 + $0x15c] sm:$0xf0]  ;;  %v1719_v30 = vor.u32 %v2471_v19, %v1716_v20  ;;  %v2552_v57 = vld [vmem:[%s3845_s1 + $0x2a4] sm:$0xf]  ;;  %v2040_v58 = vld [vmem:[%s3845_s1 + $0x2ac] sm:$0xf0]  ;;  %v1851_v61 = vor.u32 %v2504_v50, %v1848_v51 }
  0x33   :  { %v2064_v28 = vld [vmem:[%s3845_s1 + $0x2dc] sm:$0xf0]  ;;  %v1875_v33 = vor.u32 %v2510_v22, %v1872_v23  ;;  %v2528_v59 = vld [vmem:[%s3845_s1 + $0x1e4] sm:$0xf]  ;;  %v2501_v63 = vld [vmem:[%s3845_s1 + $0x10c] sm:$0xf]  ;;  %v2043_v5 = vor.u32 %v2552_v57, %v2040_v58 }
  0x34   :  { %1220 = vmatpush.bf16.msrb.mxu0 %v2123_v29  ;;  %v3148_v29 = vpack.c.b16 %v253_v13, %v253_v13  ;;  %v2160_v53 = vld [vmem:[%s3845_s1 + $0x39c] sm:$0xf0]  ;;  %v2579_v1 = vld [vmem:[%s3845_s1 + $0x37c] sm:$0xf]  ;;  %v2148_v4 = vld [vmem:[%s3845_s1 + $0x384] sm:$0xf0] }
  0x35   :  { %1246 = vmatpush.bf16.msrb.mxu2 %v2315_v32  ;;  %v1968_v32 = vld [vmem:[%s3845_s1 + $0x21c] sm:$0xf0]  ;;  %v2028_v8 = vld [vmem:[%s3845_s1 + $0x294] sm:$0xf0]  ;;  %v2525_v9 = vld [vmem:[%s3845_s1 + $0x1cc] sm:$0xf]  ;;  %v2151_v13 = vor.u32 %v2579_v1, %v2148_v4 }
  0x36   :  { %1233 = vmatpush.bf16.msrb.mxu1 %v2219_v35  ;;  %1258 = vmatpush.bf16.msrb.mxu3 %v1755_v40  ;;  %v2507_v35 = vld [vmem:[%s3845_s1 + $0x13c] sm:$0xf]  ;;  %v2172_v40 = vld [vmem:[%s3845_s1 + $0x3b4] sm:$0xf0]  ;;  %v1971_v42 = vor.u32 %v2534_v31, %v1968_v32  ;;  %v2498_v14 = vld [vmem:[%s3845_s1 + $0xf4] sm:$0xf] }
  0x37   :  { %v1863_v48 = vor.u32 %v2507_v35, %v1860_v38  ;;  %v2175_v49 = vor.u32 %v2585_v39, %v2172_v40  ;;  %v1932_v11 = vld [vmem:[%s3845_s1 + $0x1d4] sm:$0xf0]  ;;  %v1824_v15 = vld [vmem:[%s3845_s1 + $0xfc] sm:$0xf0]  ;;  %v2546_v20 = vld [vmem:[%s3845_s1 + $0x274] sm:$0xf] }
  0x38   :  { %1221 = vmatpush.bf16.msrb.mxu0 %v2111_v41  ;;  %v2067_v41 = vor.u32 %v2558_v27, %v2064_v28  ;;  %v1935_v19 = vor.u32 %v2525_v9, %v1932_v11  ;;  %v2522_v22 = vld [vmem:[%s3845_s1 + $0x1b4] sm:$0xf]  ;;  %v1920_v23 = vld [vmem:[%s3845_s1 + $0x1bc] sm:$0xf0] }
  0x39   :  { %1247 = vmatpush.bf16.msrb.mxu2 %v2303_v44  ;;  %v2052_v44 = vld [vmem:[%s3845_s1 + $0x2c4] sm:$0xf0] }
  0x3a   :  { %1234 = vmatpush.bf16.msrb.mxu1 %v2207_v47  ;;  %1259 = vmatpush.bf16.msrb.mxu3 %v1743_v52  ;;  %v1956_v47 = vld [vmem:[%s3845_s1 + $0x204] sm:$0xf0]  ;;  %v2582_v52 = vld [vmem:[%s3845_s1 + $0x394] sm:$0xf]  ;;  %v2055_v54 = vor.u32 %v2555_v43, %v2052_v44 }
  0x3b   :  { %v2163_v62 = vor.u32 %v2582_v52, %v2160_v53 }
  0x3c   :  { %1222 = vmatpush.bf16.msrb.mxu0 %v2099_v56  ;;  %v1959_v56 = vor.u32 %v2531_v46, %v1956_v47 }
  0x3d   :  { %1248 = vmatpush.bf16.msrb.mxu2 %v2291_v60  ;;  %v1944_v60 = vld [vmem:[%s3845_s1 + $0x1ec] sm:$0xf0] }
  0x3e   :  { %1235 = vmatpush.bf16.msrb.mxu1 %v2195_v0  ;;  %1260 = vmatpush.bf16.msrb.mxu3 %v1731_v7  ;;  %v1836_v0 = vld [vmem:[%s3845_s1 + $0x114] sm:$0xf0]  ;;  %v1947_v6 = vor.u32 %v2528_v59, %v1944_v60  ;;  %v2549_v7 = vld [vmem:[%s3845_s1 + $0x28c] sm:$0xf] }
  0x3f   :  { %v2031_v18 = vor.u32 %v2549_v7, %v2028_v8 }
  0x40   :  { %1223 = vmatpush.bf16.msrb.mxu0 %v2087_v12  ;;  %v1839_v12 = vor.u32 %v2501_v63, %v1836_v0 }
  0x41   :  { %1249 = vmatpush.bf16.msrb.mxu2 %v2279_v16  ;;  %v2576_v16 = vld [vmem:[%s3845_s1 + $0x364] sm:$0xf] }
  0x42   :  { %1236 = vmatpush.bf16.msrb.mxu1 %v2183_v21  ;;  %1261 = vmatpush.bf16.msrb.mxu3 %v1719_v30  ;;  %v2016_v21 = vld [vmem:[%s3845_s1 + $0x27c] sm:$0xf0] }
  0x43   :  { %1224 = vmatmul.bf16.vlgmr.msrb.gmra.mxu0 %v3140_v26 }
  0x44   :  { %1268 = vmatpush.bf16.msra.mxu0 %v1887_v17  ;;  %1250 = vmatmul.bf16.vlgmr.msrb.gmra.mxu2 %v3148_v29  ;;  %v2136_v17 = vld [vmem:[%s3845_s1 + $0x36c] sm:$0xf0] }
  0x45   :  { %1294 = vmatpush.bf16.msra.mxu2 %v2079_v24  ;;  %1237 = vmatmul.bf16.vlgmr.msrb.gmra.mxu1 %v3156_v34 }
  0x46   :  { %1281 = vmatpush.bf16.msra.mxu1 %v1983_v25  ;;  %1262 = vmatpush.bf16.msrb.mxu3 %v1707_v45 }
  0x48   :  { %1269 = vmatpush.bf16.msra.mxu0 %v1875_v33 }
  0x49   :  { %1295 = vmatpush.bf16.msra.mxu2 %v2067_v41  ;;  %1263 = vmatmul.bf16.vlgmr.msrb.gmra.mxu3 %v2975_v2 }
  0x4a   :  { %1282 = vmatpush.bf16.msra.mxu1 %v1971_v42  ;;  %1307 = vmatpush.bf16.msra.mxu3 %v2175_v49 }
  0x4c   :  { %1270 = vmatpush.bf16.msra.mxu0 %v1863_v48 }
  0x4d   :  { %1296 = vmatpush.bf16.msra.mxu2 %v2055_v54 }
  0x4e   :  { %1283 = vmatpush.bf16.msra.mxu1 %v1959_v56  ;;  %1308 = vmatpush.bf16.msra.mxu3 %v2163_v62 }
  0x50   :  { %1271 = vmatpush.bf16.msra.mxu0 %v1851_v61 }
  0x51   :  { %1297 = vmatpush.bf16.msra.mxu2 %v2043_v5 }
  0x52   :  { %1284 = vmatpush.bf16.msra.mxu1 %v1947_v6 }
  0x53   :  { %8 = vsyncpa [#allocation3], 0  ;;  %1309 = vmatpush.bf16.msra.mxu3 %v2151_v13  ;;  %v1827_v24 = vor.u32 %v2498_v14, %v1824_v15  ;;  %v2139_v25 = vor.u32 %v2576_v16, %v2136_v17  ;;  %v2495_v27 = vld [vmem:[%s3845_s1 + $0xdc] sm:$0xf]  ;;  %v1812_v28 = vld [vmem:[%s3845_s1 + $0xe4] sm:$0xf0]  ;;  %v2019_v32 = vor.u32 %v2546_v20, %v2016_v21  ;;  %v1923_v33 = vor.u32 %v2522_v22, %v1920_v23 }
  0x54   :  { %1272 = vmatpush.bf16.msra.mxu0 %v1839_v12  ;;  %v2573_v30 = vld [vmem:[%s3845_s1 + $0x34c] sm:$0xf]  ;;  %v2124_v31 = vld [vmem:[%s3845_s1 + $0x354] sm:$0xf0]  ;;  %v2543_v35 = vld [vmem:[%s3845_s1 + $0x25c] sm:$0xf]  ;;  %v1815_v39 = vor.u32 %v2495_v27, %v1812_v28 }
  0x55   :  { %1298 = vmatpush.bf16.msra.mxu2 %v2031_v18  ;;  %v2004_v36 = vld [vmem:[%s3845_s1 + $0x264] sm:$0xf0]  ;;  %v2519_v37 = vld [vmem:[%s3845_s1 + $0x19c] sm:$0xf]  ;;  %v2127_v40 = vor.u32 %v2573_v30, %v2124_v31  ;;  %v2492_v41 = vld [vmem:[%s3845_s1 + $0xc4] sm:$0xf] }
  0x56   :  { %1285 = vmatpush.bf16.msra.mxu1 %v1935_v19  ;;  %v1908_v38 = vld [vmem:[%s3845_s1 + $0x1a4] sm:$0xf0]  ;;  %v1800_v42 = vld [vmem:[%s3845_s1 + $0xcc] sm:$0xf0]  ;;  %v2609_v43 = vld [vmem:[%s3845_s1 + $0x46c] sm:$0xf]  ;;  %v2007_v47 = vor.u32 %v2543_v35, %v2004_v36 }
  0x57   :  { %1310 = vmatpush.bf16.msra.mxu3 %v2139_v25  ;;  %v2268_v44 = vld [vmem:[%s3845_s1 + $0x474] sm:$0xf0]  ;;  %v2570_v45 = vld [vmem:[%s3845_s1 + $0x334] sm:$0xf]  ;;  %v2112_v46 = vld [vmem:[%s3845_s1 + $0x33c] sm:$0xf0]  ;;  %v1911_v48 = vor.u32 %v2519_v37, %v1908_v38  ;;  %v1803_v56 = vor.u32 %v2492_v41, %v1800_v42 }
  0x58   :  { %1273 = vmatpush.bf16.msra.mxu0 %v1827_v24  ;;  %v2516_v49 = vld [vmem:[%s3845_s1 + $0x184] sm:$0xf]  ;;  %v1992_v51 = vld [vmem:[%s3845_s1 + $0x24c] sm:$0xf0]  ;;  %v2491_v54 = vld [vmem:[%s3845_s1 + $0xb8] sm:$0xf0]  ;;  %v2115_v57 = vor.u32 %v2570_v45, %v2112_v46  ;;  %v2271_v60 = vor.u32 %v2609_v43, %v2268_v44 }
  0x59   :  { %1299 = vmatpush.bf16.msra.mxu2 %v2019_v32  ;;  %v2540_v50 = vld [vmem:[%s3845_s1 + $0x244] sm:$0xf]  ;;  %v1896_v52 = vld [vmem:[%s3845_s1 + $0x18c] sm:$0xf0]  ;;  %v2633_v58 = vld [vmem:[%s3845_s1 + $0x52c] sm:$0xf] }
  0x5a   :  { %1286 = vmatpush.bf16.msra.mxu1 %v1923_v33  ;;  %v1794_v53 = vld [vmem:[%s3845_s1 + $0xb0] sm:$0xf]  ;;  %v2364_v59 = vld [vmem:[%s3845_s1 + $0x534] sm:$0xf0]  ;;  %v2567_v61 = vld [vmem:[%s3845_s1 + $0x31c] sm:$0xf]  ;;  %v1995_v63 = vor.u32 %v2540_v50, %v1992_v51  ;;  %v1899_v0 = vor.u32 %v2516_v49, %v1896_v52 }
  0x5b   :  { %1311 = vmatpush.bf16.msra.mxu3 %v2127_v40  ;;  %v2100_v62 = vld [vmem:[%s3845_s1 + $0x324] sm:$0xf0]  ;;  %v2606_v1 = vld [vmem:[%s3845_s1 + $0x454] sm:$0xf]  ;;  %v2256_v4 = vld [vmem:[%s3845_s1 + $0x45c] sm:$0xf0]  ;;  %v1795_v5 = vor.u32 %v2491_v54, %v1794_v53  ;;  %v2367_v6 = vor.u32 %v2633_v58, %v2364_v59 }
  0x5c   :  { %1274 = vmatpush.bf16.msra.mxu0 %v1815_v39  ;;  %v1782_v7 = vld [vmem:[%s3845_s1 + $0x98] sm:$0xf]  ;;  %v2488_v8 = vld [vmem:[%s3845_s1 + $0xa0] sm:$0xf0]  ;;  %v2103_v9 = vor.u32 %v2567_v61, %v2100_v62  ;;  %v2630_v11 = vld [vmem:[%s3845_s1 + $0x514] sm:$0xf]  ;;  %v2259_v13 = vor.u32 %v2606_v1, %v2256_v4 }
  0x5d   :  { %1300 = vmatpush.bf16.msra.mxu2 %v2007_v47  ;;  %v2352_v12 = vld [vmem:[%s3845_s1 + $0x51c] sm:$0xf0]  ;;  %v2603_v14 = vld [vmem:[%s3845_s1 + $0x43c] sm:$0xf]  ;;  %v2564_v15 = vld [vmem:[%s3845_s1 + $0x304] sm:$0xf]  ;;  %v1783_v20 = vor.u32 %v2488_v8, %v1782_v7 }
  0x5e   :  { %1287 = vmatpush.bf16.msra.mxu1 %v1911_v48  ;;  %v2088_v16 = vld [vmem:[%s3845_s1 + $0x30c] sm:$0xf0]  ;;  %v2244_v17 = vld [vmem:[%s3845_s1 + $0x444] sm:$0xf0]  ;;  %v2515_v19 = vld [vmem:[%s3845_s1 + $0x178] sm:$0xf0]  ;;  %v2355_v21 = vor.u32 %v2630_v11, %v2352_v12 }
  0x5f   :  { %1312 = vmatpush.bf16.msra.mxu3 %v2115_v57  ;;  %v1890_v18 = vld [vmem:[%s3845_s1 + $0x170] sm:$0xf]  ;;  %v1770_v22 = vld [vmem:[%s3845_s1 + $0x80] sm:$0xf]  ;;  %v2485_v23 = vld [vmem:[%s3845_s1 + $0x88] sm:$0xf0]  ;;  %v2091_v24 = vor.u32 %v2564_v15, %v2088_v16  ;;  %v2247_v28 = vor.u32 %v2603_v14, %v2244_v17 }
  0x60   :  { %1275 = vmatpush.bf16.msra.mxu0 %v1803_v56  ;;  %v2627_v25 = vld [vmem:[%s3845_s1 + $0x4fc] sm:$0xf]  ;;  %v2340_v27 = vld [vmem:[%s3845_s1 + $0x504] sm:$0xf0]  ;;  %v1891_v30 = vor.u32 %v2515_v19, %v1890_v18  ;;  %v2600_v31 = vld [vmem:[%s3845_s1 + $0x424] sm:$0xf]  ;;  %v1771_v36 = vor.u32 %v2485_v23, %v1770_v22 }
  0x61   :  { %1301 = vmatpush.bf16.msra.mxu2 %v1995_v63  ;;  %v2232_v32 = vld [vmem:[%s3845_s1 + $0x42c] sm:$0xf0]  ;;  %v1878_v33 = vld [vmem:[%s3845_s1 + $0x158] sm:$0xf]  ;;  %v2512_v35 = vld [vmem:[%s3845_s1 + $0x160] sm:$0xf0]  ;;  %v2343_v37 = vor.u32 %v2627_v25, %v2340_v27 }
  0x62   :  { %1288 = vmatpush.bf16.msra.mxu1 %v1899_v0  ;;  %v1758_v38 = vld [vmem:[%s3845_s1 + $0x68] sm:$0xf]  ;;  %v2482_v39 = vld [vmem:[%s3845_s1 + $0x70] sm:$0xf0]  ;;  %v2624_v40 = vld [vmem:[%s3845_s1 + $0x4e4] sm:$0xf]  ;;  %v2235_v42 = vor.u32 %v2600_v31, %v2232_v32  ;;  %v1879_v43 = vor.u32 %v2512_v35, %v1878_v33 }
  0x63   :  { %1276 = vmatmul.bf16.vlgmr.msra.gmra.mxu0 %v2977_v3  ;;  %1313 = vmatpush.bf16.msra.mxu3 %v2103_v9  ;;  %v2328_v41 = vld [vmem:[%s3845_s1 + $0x4ec] sm:$0xf0]  ;;  %v2597_v44 = vld [vmem:[%s3845_s1 + $0x40c] sm:$0xf]  ;;  %v2220_v45 = vld [vmem:[%s3845_s1 + $0x414] sm:$0xf0]  ;;  %v1759_v48 = vor.u32 %v2482_v39, %v1758_v38 }
  0x64   :  { %1320 = vmatpush.bf16.msrb.mxu0 %v2271_v60  ;;  %1302 = vmatmul.bf16.vlgmr.msra.gmra.mxu2 %v2992_v10  ;;  %v1866_v46 = vld [vmem:[%s3845_s1 + $0x140] sm:$0xf]  ;;  %v2509_v47 = vld [vmem:[%s3845_s1 + $0x148] sm:$0xf0]  ;;  %v2331_v49 = vor.u32 %v2624_v40, %v2328_v41  ;;  %v1746_v50 = vld [vmem:[%s3845_s1 + $0x50] sm:$0xf]  ;;  %v2223_v54 = vor.u32 %v2597_v44, %v2220_v45 }
  0x65   :  { %1346 = vmatpush.bf16.msrb.mxu2 %v1795_v5  ;;  %1289 = vmatmul.bf16.vlgmr.msra.gmra.mxu1 %v2960_v55  ;;  %v2479_v51 = vld [vmem:[%s3845_s1 + $0x58] sm:$0xf0]  ;;  %v2621_v52 = vld [vmem:[%s3845_s1 + $0x4cc] sm:$0xf]  ;;  %v2316_v53 = vld [vmem:[%s3845_s1 + $0x4d4] sm:$0xf0]  ;;  %v1867_v56 = vor.u32 %v2509_v47, %v1866_v46 }
  0x66   :  { %1333 = vmatpush.bf16.msrb.mxu1 %v2367_v6  ;;  %v2594_v57 = vld [vmem:[%s3845_s1 + $0x3f4] sm:$0xf]  ;;  %v2208_v58 = vld [vmem:[%s3845_s1 + $0x3fc] sm:$0xf0]  ;;  %v1854_v59 = vld [vmem:[%s3845_s1 + $0x128] sm:$0xf]  ;;  %v1747_v61 = vor.u32 %v2479_v51, %v1746_v50  ;;  %v2319_v62 = vor.u32 %v2621_v52, %v2316_v53 }
  0x67   :  { %1314 = vmatpush.bf16.msra.mxu3 %v2091_v24  ;;  %v2506_v60 = vld [vmem:[%s3845_s1 + $0x130] sm:$0xf0]  ;;  %v1734_v63 = vld [vmem:[%s3845_s1 + $0x38] sm:$0xf]  ;;  %v2476_v0 = vld [vmem:[%s3845_s1 + $0x40] sm:$0xf0]  ;;  %v2211_v5 = vor.u32 %v2594_v57, %v2208_v58 }
  0x68   :  { %1321 = vmatpush.bf16.msrb.mxu0 %v2259_v13  ;;  %v2618_v1 = vld [vmem:[%s3845_s1 + $0x4b4] sm:$0xf]  ;;  %v2304_v4 = vld [vmem:[%s3845_s1 + $0x4bc] sm:$0xf0]  ;;  %v1855_v6 = vor.u32 %v2506_v60, %v1854_v59  ;;  %v2591_v7 = vld [vmem:[%s3845_s1 + $0x3dc] sm:$0xf]  ;;  %v1735_v12 = vor.u32 %v2476_v0, %v1734_v63 }
  0x69   :  { %1347 = vmatpush.bf16.msrb.mxu2 %v1783_v20  ;;  %v2196_v8 = vld [vmem:[%s3845_s1 + $0x3e4] sm:$0xf0]  ;;  %v1842_v9 = vld [vmem:[%s3845_s1 + $0x110] sm:$0xf]  ;;  %v2503_v11 = vld [vmem:[%s3845_s1 + $0x118] sm:$0xf0]  ;;  %v2307_v13 = vor.u32 %v2618_v1, %v2304_v4 }
  0x6a   :  { %1334 = vmatpush.bf16.msrb.mxu1 %v2355_v21  ;;  %1315 = vmatmul.bf16.vlgmr.msra.gmra.mxu3 %v3140_v26  ;;  %v1722_v14 = vld [vmem:[%s3845_s1 + $0x20] sm:$0xf]  ;;  %v2473_v15 = vld [vmem:[%s3845_s1 + $0x28] sm:$0xf0]  ;;  %v2615_v16 = vld [vmem:[%s3845_s1 + $0x49c] sm:$0xf]  ;;  %v2199_v18 = vor.u32 %v2591_v7, %v2196_v8  ;;  %v1843_v19 = vor.u32 %v2503_v11, %v1842_v9 }
  0x6b   :  { %1359 = vmatpush.bf16.msrb.mxu3 %v1891_v30  ;;  %v2292_v17 = vld [vmem:[%s3845_s1 + $0x4a4] sm:$0xf0]  ;;  %v2588_v20 = vld [vmem:[%s3845_s1 + $0x3c4] sm:$0xf]  ;;  %v2184_v21 = vld [vmem:[%s3845_s1 + $0x3cc] sm:$0xf0]  ;;  %v1723_v27 = vor.u32 %v2473_v15, %v1722_v14 }
  0x6c   :  { %1322 = vmatpush.bf16.msrb.mxu0 %v2247_v28  ;;  %v1986_v22 = vld [vmem:[%s3845_s1 + $0x230] sm:$0xf]  ;;  %v2539_v23 = vld [vmem:[%s3845_s1 + $0x238] sm:$0xf0]  ;;  %v1830_v24 = vld [vmem:[%s3845_s1 + $0xf8] sm:$0xf]  ;;  %v2295_v28 = vor.u32 %v2615_v16, %v2292_v17 }
  0x6d   :  { %1348 = vmatpush.bf16.msrb.mxu2 %v1771_v36  ;;  %v2500_v25 = vld [vmem:[%s3845_s1 + $0x100] sm:$0xf0]  ;;  %v1710_v31 = vld [vmem:[%s3845_s1 + $0x8] sm:$0xf]  ;;  %v2470_v32 = vld [vmem:[%s3845_s1 + $0x10] sm:$0xf0]  ;;  %v1987_v41 = vor.u32 %v2539_v23, %v1986_v22 }
  0x6e   :  { %1335 = vmatpush.bf16.msrb.mxu1 %v2343_v37  ;;  %v2612_v30 = vld [vmem:[%s3845_s1 + $0x484] sm:$0xf]  ;;  %v2280_v33 = vld [vmem:[%s3845_s1 + $0x48c] sm:$0xf0]  ;;  %v2587_v36 = vld [vmem:[%s3845_s1 + $0x3b8] sm:$0xf0]  ;;  %v2187_v37 = vor.u32 %v2588_v20, %v2184_v21  ;;  %v1831_v38 = vor.u32 %v2500_v25, %v1830_v24  ;;  %v1711_v44 = vor.u32 %v2470_v32, %v1710_v31 }
  0x6f   :  { %1360 = vmatpush.bf16.msrb.mxu3 %v1879_v43  ;;  %v2178_v35 = vld [vmem:[%s3845_s1 + $0x3b0] sm:$0xf]  ;;  %v2563_v40 = vld [vmem:[%s3845_s1 + $0x2f8] sm:$0xf0]  ;;  %v2497_v43 = vld [vmem:[%s3845_s1 + $0xe8] sm:$0xf0]  ;;  %v2283_v45 = vor.u32 %v2612_v30, %v2280_v33 }
  0x70   :  { %1323 = vmatpush.bf16.msrb.mxu0 %v2235_v42  ;;  %v2082_v39 = vld [vmem:[%s3845_s1 + $0x2f0] sm:$0xf]  ;;  %v1818_v42 = vld [vmem:[%s3845_s1 + $0xe0] sm:$0xf]  ;;  %v1974_v46 = vld [vmem:[%s3845_s1 + $0x218] sm:$0xf] }
  0x71   :  { %1349 = vmatpush.bf16.msrb.mxu2 %v1759_v48  ;;  %v2536_v47 = vld [vmem:[%s3845_s1 + $0x220] sm:$0xf0]  ;;  %v2179_v48 = vor.u32 %v2587_v36, %v2178_v35  ;;  %v2166_v50 = vld [vmem:[%s3845_s1 + $0x398] sm:$0xf]  ;;  %v1819_v52 = vor.u32 %v2497_v43, %v1818_v42  ;;  %v1962_v57 = vld [vmem:[%s3845_s1 + $0x200] sm:$0xf] }
  0x72   :  { %1336 = vmatpush.bf16.msrb.mxu1 %v2331_v49  ;;  %v2083_v49 = vor.u32 %v2563_v40, %v2082_v39  ;;  %v2584_v51 = vld [vmem:[%s3845_s1 + $0x3a0] sm:$0xf0]  ;;  %v2070_v53 = vld [vmem:[%s3845_s1 + $0x2d8] sm:$0xf]  ;;  %v1806_v58 = vld [vmem:[%s3845_s1 + $0xc8] sm:$0xf] }
  0x73   :  { %1361 = vmatpush.bf16.msrb.mxu3 %v1867_v56  ;;  %v1975_v56 = vor.u32 %v2536_v47, %v1974_v46  ;;  %v2494_v59 = vld [vmem:[%s3845_s1 + $0xd0] sm:$0xf0]  ;;  %v2533_v60 = vld [vmem:[%s3845_s1 + $0x208] sm:$0xf0]  ;;  %v2167_v63 = vor.u32 %v2584_v51, %v2166_v50  ;;  %v2154_v1 = vld [vmem:[%s3845_s1 + $0x380] sm:$0xf] }
  0x74   :  { %1324 = vmatpush.bf16.msrb.mxu0 %v2223_v54  ;;  %v2560_v54 = vld [vmem:[%s3845_s1 + $0x2e0] sm:$0xf0]  ;;  %v2581_v4 = vld [vmem:[%s3845_s1 + $0x388] sm:$0xf0]  ;;  %v1963_v8 = vor.u32 %v2533_v60, %v1962_v57  ;;  %v1950_v11 = vld [vmem:[%s3845_s1 + $0x1e8] sm:$0xf] }
  0x75   :  { %1350 = vmatpush.bf16.msrb.mxu2 %v1747_v61  ;;  %v2274_v61 = vld [vmem:[%s3845_s1 + $0x470] sm:$0xf]  ;;  %v2071_v0 = vor.u32 %v2560_v54, %v2070_v53  ;;  %v2557_v7 = vld [vmem:[%s3845_s1 + $0x2c8] sm:$0xf0]  ;;  %v2155_v14 = vor.u32 %v2581_v4, %v2154_v1  ;;  %v2142_v16 = vld [vmem:[%s3845_s1 + $0x368] sm:$0xf] }
  0x76   :  { %1337 = vmatpush.bf16.msrb.mxu1 %v2319_v62  ;;  %v2611_v62 = vld [vmem:[%s3845_s1 + $0x478] sm:$0xf0]  ;;  %v2578_v17 = vld [vmem:[%s3845_s1 + $0x370] sm:$0xf0]  ;;  %v1938_v22 = vld [vmem:[%s3845_s1 + $0x1d0] sm:$0xf] }
  0x77   :  { %1362 = vmatpush.bf16.msrb.mxu3 %v1855_v6  ;;  %v2058_v6 = vld [vmem:[%s3845_s1 + $0x2c0] sm:$0xf]  ;;  %v2275_v9 = vor.u32 %v2611_v62, %v2274_v61  ;;  %v2527_v23 = vld [vmem:[%s3845_s1 + $0x1d8] sm:$0xf0]  ;;  %v2605_v25 = vld [vmem:[%s3845_s1 + $0x448] sm:$0xf0] }
  0x78   :  { %1325 = vmatpush.bf16.msrb.mxu0 %v2211_v5  ;;  %v1807_v5 = vor.u32 %v2494_v59, %v1806_v58  ;;  %v2059_v15 = vor.u32 %v2557_v7, %v2058_v6  ;;  %v2250_v24 = vld [vmem:[%s3845_s1 + $0x440] sm:$0xf]  ;;  %v2130_v30 = vld [vmem:[%s3845_s1 + $0x350] sm:$0xf]  ;;  %v2575_v31 = vld [vmem:[%s3845_s1 + $0x358] sm:$0xf0]  ;;  %v1939_v35 = vor.u32 %v2527_v23, %v1938_v22 }
  0x79   :  { %1351 = vmatpush.bf16.msrb.mxu2 %v1735_v12  ;;  %v2530_v12 = vld [vmem:[%s3845_s1 + $0x1f0] sm:$0xf0]  ;;  %v2034_v32 = vld [vmem:[%s3845_s1 + $0x290] sm:$0xf]  ;;  %v2551_v33 = vld [vmem:[%s3845_s1 + $0x298] sm:$0xf0]  ;;  %v2251_v36 = vor.u32 %v2605_v25, %v2250_v24  ;;  %v2131_v40 = vor.u32 %v2575_v31, %v2130_v30 }
  0x7a   :  { %1338 = vmatpush.bf16.msrb.mxu1 %v2307_v13  ;;  %v2262_v13 = vld [vmem:[%s3845_s1 + $0x458] sm:$0xf]  ;;  %v1951_v20 = vor.u32 %v2530_v12, %v1950_v11  ;;  %v2602_v39 = vld [vmem:[%s3845_s1 + $0x430] sm:$0xf0]  ;;  %v2572_v43 = vld [vmem:[%s3845_s1 + $0x340] sm:$0xf0] }
  0x7b   :  { %1363 = vmatpush.bf16.msrb.mxu3 %v1843_v19  ;;  %v2554_v19 = vld [vmem:[%s3845_s1 + $0x2b0] sm:$0xf0]  ;;  %v2118_v42 = vld [vmem:[%s3845_s1 + $0x338] sm:$0xf]  ;;  %v2226_v50 = vld [vmem:[%s3845_s1 + $0x410] sm:$0xf] }
  0x7c   :  { %1326 = vmatpush.bf16.msrb.mxu0 %v2199_v18  ;;  %v2046_v18 = vld [vmem:[%s3845_s1 + $0x2a8] sm:$0xf]  ;;  %v2599_v51 = vld [vmem:[%s3845_s1 + $0x418] sm:$0xf0]  ;;  %v2106_v54 = vld [vmem:[%s3845_s1 + $0x320] sm:$0xf] }
  0x7d   :  { %1352 = vmatpush.bf16.msrb.mxu2 %v1723_v27  ;;  %v2143_v27 = vor.u32 %v2578_v17, %v2142_v16  ;;  %v2010_v57 = vld [vmem:[%s3845_s1 + $0x260] sm:$0xf]  ;;  %v2545_v58 = vld [vmem:[%s3845_s1 + $0x268] sm:$0xf0]  ;;  %v2227_v60 = vor.u32 %v2599_v51, %v2226_v50  ;;  %v1902_v61 = vld [vmem:[%s3845_s1 + $0x188] sm:$0xf] }
  0x7e   :  { %1339 = vmatpush.bf16.msrb.mxu1 %v2295_v28  ;;  %v2047_v28 = vor.u32 %v2554_v19, %v2046_v18  ;;  %v2518_v62 = vld [vmem:[%s3845_s1 + $0x190] sm:$0xf0]  ;;  %v2596_v1 = vld [vmem:[%s3845_s1 + $0x400] sm:$0xf0]  ;;  %v2011_v6 = vor.u32 %v2545_v58, %v2010_v57  ;;  %v2094_v7 = vld [vmem:[%s3845_s1 + $0x308] sm:$0xf] }
  0x7f   :  { %1364 = vmatpush.bf16.msrb.mxu3 %v1831_v38  ;;  %v2238_v38 = vld [vmem:[%s3845_s1 + $0x428] sm:$0xf]  ;;  %v2542_v11 = vld [vmem:[%s3845_s1 + $0x250] sm:$0xf0]  ;;  %v1903_v12 = vor.u32 %v2518_v62, %v1902_v61  ;;  %v2358_v17 = vld [vmem:[%s3845_s1 + $0x518] sm:$0xf] }
  0x80   :  { %1327 = vmatpush.bf16.msrb.mxu0 %v2187_v37  ;;  %v1926_v37 = vld [vmem:[%s3845_s1 + $0x1b8] sm:$0xf]  ;;  %v2239_v47 = vor.u32 %v2602_v39, %v2238_v38  ;;  %v2632_v18 = vld [vmem:[%s3845_s1 + $0x520] sm:$0xf0]  ;;  %v2190_v23 = vld [vmem:[%s3845_s1 + $0x3c8] sm:$0xf] }
  0x81   :  { %1353 = vmatpush.bf16.msrb.mxu2 %v1711_v44  ;;  %v2022_v44 = vld [vmem:[%s3845_s1 + $0x278] sm:$0xf]  ;;  %v2359_v22 = vor.u32 %v2632_v18, %v2358_v17  ;;  %v2590_v24 = vld [vmem:[%s3845_s1 + $0x3d0] sm:$0xf0]  ;;  %v2346_v25 = vld [vmem:[%s3845_s1 + $0x500] sm:$0xf] }
  0x82   :  { %1340 = vmatpush.bf16.msrb.mxu1 %v2283_v45  ;;  %v2548_v45 = vld [vmem:[%s3845_s1 + $0x280] sm:$0xf0]  ;;  %v2191_v30 = vor.u32 %v2590_v24, %v2190_v23  ;;  %v2651_v62 = vld [vmem:[%s3846_s2 + $0x78] sm:$0xff]  ;;  %v2645_v24 = vld [vmem:[%s3846_s2 + $0x48] sm:$0xff]  ;;  %s1691_s22 = sshll.u32 %s3847_s3, 4  ;;  %s1692_s22 = int_to_ptr.hbm [resolvable:$true] %s1691_s22 }
  0x83   :  { %1328 = vmatmul.bf16.vlgmr.msrb.gmra.mxu0 %v3156_v34  ;;  %1365 = vmatpush.bf16.msrb.mxu3 %v1819_v52  ;;  %v2119_v52 = vor.u32 %v2572_v43, %v2118_v42  ;;  %v2023_v53 = vor.u32 %v2548_v45, %v2022_v44  ;;  %v2620_v38 = vld [vmem:[%s3845_s1 + $0x4c0] sm:$0xf0]  ;;  %v2298_v42 = vld [vmem:[%s3845_s1 + $0x4a0] sm:$0xf]  ;;  %v2617_v43 = vld [vmem:[%s3845_s1 + $0x4a8] sm:$0xf0] }
  0x84   :  { %1372 = vmatpush.bf16.msra.mxu0 %v1987_v41  ;;  %1354 = vmatmul.bf16.vlgmr.msrb.gmra.mxu2 %v2975_v2  ;;  %v2608_v2 = vld [vmem:[%s3845_s1 + $0x460] sm:$0xf0]  ;;  %v2035_v41 = vor.u32 %v2551_v33, %v2034_v32  ;;  %v2334_v32 = vld [vmem:[%s3845_s1 + $0x4e8] sm:$0xf]  ;;  %v2299_v45 = vor.u32 %v2617_v43, %v2298_v42 }
  0x85   :  { %1398 = vmatpush.bf16.msra.mxu2 %v2179_v48  ;;  %1341 = vmatmul.bf16.vlgmr.msrb.gmra.mxu1 %v3148_v29  ;;  %v2263_v21 = vor.u32 %v2608_v2, %v2262_v13  ;;  %v1914_v48 = vld [vmem:[%s3845_s1 + $0x1a0] sm:$0xf]  ;;  %v2641_v33 = vld [vmem:[%s3846_s2 + $0x28] sm:$0xff] }
  0x86   :  { %1385 = vmatpush.bf16.msra.mxu1 %v2083_v49  ;;  %v2521_v49 = vld [vmem:[%s3845_s1 + $0x1a8] sm:$0xf0]  ;;  %v2648_v17 = vld [vmem:[%s3846_s2 + $0x60] sm:$0xff] }
  0x87   :  { %1366 = vmatpush.bf16.msrb.mxu3 %v1807_v5  ;;  %v1915_v59 = vor.u32 %v2521_v49, %v1914_v48  ;;  %v2635_v5 = vld [vmem:[%s3845_s1 + $0x538] sm:$0xf0]  ;;  %v2614_v48 = vld [vmem:[%s3845_s1 + $0x490] sm:$0xf0] }
  0x88   :  { %1373 = vmatpush.bf16.msra.mxu0 %v1975_v56  ;;  %v2569_v56 = vld [vmem:[%s3845_s1 + $0x328] sm:$0xf0] }
  0x89   :  { %1399 = vmatpush.bf16.msra.mxu2 %v2167_v63  ;;  %v2370_v63 = vld [vmem:[%s3845_s1 + $0x530] sm:$0xf]  ;;  %v2107_v4 = vor.u32 %v2569_v56, %v2106_v54  ;;  %v2636_v56 = vld [vmem:[%s3846_s2] sm:$0xff] }
  0x8a   :  { %1386 = vmatpush.bf16.msra.mxu1 %v2071_v0  ;;  %1367 = vmatmul.bf16.vlgmr.msrb.gmra.mxu3 %v2977_v3  ;;  %v2524_v3 = vld [vmem:[%s3845_s1 + $0x1c0] sm:$0xf0]  ;;  %v2214_v0 = vld [vmem:[%s3845_s1 + $0x3f8] sm:$0xf]  ;;  %v2371_v2 = vor.u32 %v2635_v5, %v2370_v63 }
  0x8b   :  { %1411 = vmatpush.bf16.msra.mxu3 %v2275_v9  ;;  %v1927_v46 = vor.u32 %v2524_v3, %v1926_v37  ;;  %v1998_v9 = vld [vmem:[%s3845_s1 + $0x248] sm:$0xf]  ;;  %v2215_v13 = vor.u32 %v2596_v1, %v2214_v0  ;;  %v2310_v3 = vld [vmem:[%s3845_s1 + $0x4b8] sm:$0xf] }
  0x8c   :  { %1374 = vmatpush.bf16.msra.mxu0 %v1963_v8  ;;  %v2566_v8 = vld [vmem:[%s3845_s1 + $0x310] sm:$0xf0]  ;;  %v1999_v19 = vor.u32 %v2542_v11, %v1998_v9 }
  0x8d   :  { %1400 = vmatpush.bf16.msra.mxu2 %v2155_v14  ;;  %v2202_v14 = vld [vmem:[%s3845_s1 + $0x3e0] sm:$0xf]  ;;  %v2095_v16 = vor.u32 %v2566_v8, %v2094_v7 }
  0x8e   :  { %1387 = vmatpush.bf16.msra.mxu1 %v2059_v15  ;;  %v2593_v15 = vld [vmem:[%s3845_s1 + $0x3e8] sm:$0xf0] }
  0x8f   :  { %1412 = vmatpush.bf16.msra.mxu3 %v2263_v21  ;;  %v2643_v21 = vld [vmem:[%s3846_s2 + $0x38] sm:$0xff] }
  0x90   :  { %1375 = vmatpush.bf16.msra.mxu0 %v1951_v20  ;;  %v2203_v20 = vor.u32 %v2593_v15, %v2202_v14 }
  0x91   :  { %1401 = vmatpush.bf16.msra.mxu2 %v2143_v27  ;;  %v2629_v27 = vld [vmem:[%s3845_s1 + $0x508] sm:$0xf0] }
  0x92   :  { %1388 = vmatpush.bf16.msra.mxu1 %v2047_v28  ;;  %v2642_v28 = vld [vmem:[%s3846_s2 + $0x30] sm:$0xff]  ;;  %v2347_v31 = vor.u32 %v2629_v27, %v2346_v25  ;;  %v2644_v27 = vld [vmem:[%s3846_s2 + $0x40] sm:$0xff] }
  0x93   :  { %1413 = vmatpush.bf16.msra.mxu3 %v2251_v36  ;;  %v2640_v36 = vld [vmem:[%s3846_s2 + $0x20] sm:$0xff] }
  0x94   :  { %1376 = vmatpush.bf16.msra.mxu0 %v1939_v35  ;;  %v2623_v35 = vld [vmem:[%s3845_s1 + $0x4d8] sm:$0xf0] }
  0x95   :  { %1402 = vmatpush.bf16.msra.mxu2 %v2131_v40  ;;  %v2311_v40 = vor.u32 %v2620_v38, %v2310_v3  ;;  %v2659_v38 = vld [vmem:[%s3846_s2 + $0xb8] sm:$0xff] }
  0x96   :  { %1389 = vmatpush.bf16.msra.mxu1 %v2035_v41  ;;  %v2639_v41 = vld [vmem:[%s3846_s2 + $0x18] sm:$0xff] }
  0x97   :  { %1414 = vmatpush.bf16.msra.mxu3 %v2239_v47  ;;  %v2286_v47 = vld [vmem:[%s3845_s1 + $0x488] sm:$0xf] }
  0x98   :  { %1377 = vmatpush.bf16.msra.mxu0 %v1927_v46  ;;  %v2638_v46 = vld [vmem:[%s3846_s2 + $0x10] sm:$0xff]  ;;  %v2287_v50 = vor.u32 %v2614_v48, %v2286_v47 }
  0x99   :  { %1403 = vmatpush.bf16.msra.mxu2 %v2119_v52 }
  0x9a   :  { %1390 = vmatpush.bf16.msra.mxu1 %v2023_v53  ;;  %v2637_v53 = vld [vmem:[%s3846_s2 + $0x8] sm:$0xff] }
  0x9b   :  { %1415 = vmatpush.bf16.msra.mxu3 %v2227_v60 }
  0x9c   :  { %1378 = vmatpush.bf16.msra.mxu0 %v1915_v59 }
  0x9d   :  { %1404 = vmatpush.bf16.msra.mxu2 %v2107_v4  ;;  %v2650_v4 = vld [vmem:[%s3846_s2 + $0x70] sm:$0xff] }
  0x9e   :  { %1391 = vmatpush.bf16.msra.mxu1 %v2011_v6 }
  0x9f   :  { %1416 = vmatpush.bf16.msra.mxu3 %v2215_v13 }
  0xa0   :  { %1379 = vmatpush.bf16.msra.mxu0 %v1903_v12  ;;  %v1173_v39 = vpop.f32.mrf.mxu0 }
  0xa1   :  { %1405 = vmatpush.bf16.msra.mxu2 %v2095_v16 }
  0xa2   :  { %1392 = vmatpush.bf16.msra.mxu1 %v1999_v19  ;;  %v2647_v19 = vld [vmem:[%s3846_s2 + $0x58] sm:$0xff] }
  0xa3   :  { %1380 = vmatmul.bf16.vlgmr.msra.gmra.mxu0 %v2960_v55  ;;  %1417 = vmatpush.bf16.msra.mxu3 %v2203_v20  ;;  %v2626_v55 = vld [vmem:[%s3845_s1 + $0x4f0] sm:$0xf0] }
  0xa4   :  { %1424 = vmatpush.bf16.msrb.mxu0 %v2371_v2  ;;  %1406 = vmatmul.bf16.vlgmr.msra.gmra.mxu2 %v3140_v26  ;;  %v2335_v26 = vor.u32 %v2626_v55, %v2334_v32 }
  0xa5   :  { %1393 = vmatmul.bf16.vlgmr.msra.gmra.mxu1 %v2992_v10  ;;  %v2322_v10 = vld [vmem:[%s3845_s1 + $0x4d0] sm:$0xf]  ;;  %1657 = vmatpush.bf16.msrb.mxu2 %v2651_v62 }
  0xa6   :  { %1644 = vmatpush.bf16.msrb.mxu1 %v2643_v21  ;;  %v2323_v37 = vor.u32 %v2623_v35, %v2322_v10  ;;  %v2646_v21 = vld [vmem:[%s3846_s2 + $0x50] sm:$0xff] }
  0xa7   :  { %1418 = vmatpush.bf16.msra.mxu3 %v2191_v30  ;;  %v1199_v44 = vpop.f32.mrf.mxu2 }
  0xa8   :  { %1425 = vmatpush.bf16.msrb.mxu0 %v2359_v22  ;;  %v1175_v49 = vpop.f32.mrf.mxu0 }
  0xa9   :  { %1658 = vmatpush.bf16.msrb.mxu2 %v2650_v4  ;;  %v2656_v49 = vld [vmem:[%s3846_s2 + $0xa0] sm:$0xff] }
  0xaa   :  { %1645 = vmatpush.bf16.msrb.mxu1 %v2642_v28  ;;  %1419 = vmatmul.bf16.vlgmr.msra.gmra.mxu3 %v3156_v34  ;;  %v1186_v34 = vpop.f32.mrf.mxu1 }
  0xab   :  { %v1187_v57 = vadd.f32 %v1186_v34, %v1173_v39  ;;  %1670 = vmatpush.bf16.msrb.mxu3 %v2659_v38 }
  0xac   :  { %1426 = vmatpush.bf16.msrb.mxu0 %v2347_v31  ;;  %v1212_v52 = vpop.f32.mrf.mxu3 }
  0xad   :  { %v1200_v59 = vadd.f32 %v1199_v44, %v1187_v57  ;;  %v2653_v57 = vld [vmem:[%s3846_s2 + $0x88] sm:$0xff] }
  0xae   :  { %1646 = vmatpush.bf16.msrb.mxu1 %v2641_v33 }
  0xaf   :  { %v1201_v54 = vpop.f32.mrf.mxu2  ;;  %v1213_v60 = vadd.f32 %v1212_v52, %v1200_v59 }
  0xb0   :  { %1427 = vmatpush.bf16.msrb.mxu0 %v2335_v26  ;;  %v2654_v54 = vld [vmem:[%s3846_s2 + $0x90] sm:$0xff] }
  0xb2   :  { %1647 = vmatpush.bf16.msrb.mxu1 %v2640_v36  ;;  %v1188_v51 = vpop.f32.mrf.mxu1 }
  0xb3   :  { %v2655_v51 = vld [vmem:[%s3846_s2 + $0x98] sm:$0xff] }
  0xb4   :  { %1428 = vmatpush.bf16.msrb.mxu0 %v2323_v37  ;;  %v1214_v58 = vpop.f32.mrf.mxu3 }
  0xb6   :  { %1648 = vmatpush.bf16.msrb.mxu1 %v2639_v41  ;;  %v2658_v41 = vld [vmem:[%s3846_s2 + $0xb0] sm:$0xff] }
  0xb7   :  { %1671 = vmatpush.bf16.msrb.mxu3 %v2658_v41 }
  0xb8   :  { %1429 = vmatpush.bf16.msrb.mxu0 %v2311_v40 }
  0xba   :  { %1649 = vmatpush.bf16.msrb.mxu1 %v2638_v46 }
  0xbc   :  { %1430 = vmatpush.bf16.msrb.mxu0 %v2299_v45  ;;  %v2657_v45 = vld [vmem:[%s3846_s2 + $0xa8] sm:$0xff] }
  0xbd   :  { %1672 = vmatpush.bf16.msrb.mxu3 %v2657_v45 }
  0xbe   :  { %1650 = vmatpush.bf16.msrb.mxu1 %v2637_v53 }
  0xc0   :  { %1431 = vmatpush.bf16.msrb.mxu0 %v2287_v50  ;;  %v1225_v61 = vpop.f32.mrf.mxu0 }
  0xc1   :  { %v1226_v63 = vadd.f32 %v1225_v61, %v1213_v60  ;;  %1673 = vmatpush.bf16.msrb.mxu3 %v2656_v49  ;;  %v2652_v60 = vld [vmem:[%s3846_s2 + $0x80] sm:$0xff] }
  0xc2   :  { %1651 = vmatpush.bf16.msrb.mxu1 %v2636_v56  ;;  %v1238_v0 = vpop.f32.mrf.mxu1 }
  0xc3   :  { %1432 = vmatmul.bf16.vlgmr.msrb.gmra.mxu0 %v3148_v29  ;;  %v1239_v1 = vadd.f32 %v1238_v0, %v1226_v63  ;;  %v2649_v29 = vld [vmem:[%s3846_s2 + $0x68] sm:$0xff]  ;;  %s2693_s2 = smov [#allocation2]  }
  0xc4   :  { %1659 = vmatpush.bf16.msrb.mxu2 %v2649_v29  ;;  %s1689_s19 = sshll.u32 %s2693_s2, 4  ;;  %s1690_s19 = int_to_ptr.vmem [resolvable:$true] %s1689_s19 }
  0xc5   :  { %1674 = vmatpush.bf16.msrb.mxu3 %v2655_v51 }
  0xc7   :  { %v1251_v5 = vpop.f32.mrf.mxu2 }
  0xc8   :  { %v1252_v6 = vadd.f32 %v1251_v5, %v1239_v1  ;;  %v1227_v7 = vpop.f32.mrf.mxu0  ;;  %1660 = vmatpush.bf16.msrb.mxu2 %v2648_v17 }
  0xc9   :  { %1675 = vmatpush.bf16.msrb.mxu3 %v2654_v54 }
  0xca   :  { %v1437_v8 = vmul.f32 0.5, %v1252_v6  ;;  %v1240_v9 = vpop.f32.mrf.mxu1 }
  0xcc   :  { %2661 = vtanh.f32 %v1437_v8  ;;  %v1264_v11 = vpop.f32.mrf.mxu3  ;;  %1661 = vmatpush.bf16.msrb.mxu2 %v2647_v19 }
  0xcd   :  { %1676 = vmatpush.bf16.msrb.mxu3 %v2653_v57 }
  0xcf   :  { %v1253_v12 = vpop.f32.mrf.mxu2 }
  0xd0   :  { %1662 = vmatpush.bf16.msrb.mxu2 %v2646_v21 }
  0xd1   :  { %1677 = vmatpush.bf16.msrb.mxu3 %v2652_v60 }
  0xd2   :  { %v2662_v13 = vpop.eup %2661 }
  0xd3   :  { %v1443_v2 = vadd.f32 1.0, %v2662_v13 }
  0xd4   :  { %v1266_v15 = vpop.f32.mrf.mxu3  ;;  %1663 = vmatpush.bf16.msrb.mxu2 %v2645_v24 }
  0xd5   :  { %v1446_v14 = vmul.f32 0.5, %v1443_v2 }
  0xd7   :  { %v1449_v16 = vpack.c.bf16 %v1446_v14, %v1446_v14 }
  0xd8   :  { %1664 = vmatpush.bf16.msrb.mxu2 %v2644_v27 }
  0xd9   :  { %1652 = vmatmul.bf16.vlgmr.msrb.gmra.mxu1 %v1449_v16 }
  0xe0   :  { %v1277_v18 = vpop.f32.mrf.mxu0 }
  0xe1   :  { %v1278_v28 = vadd.f32 %v1277_v18, %v1264_v11 }
  0xe2   :  { %v1290_v20 = vpop.f32.mrf.mxu1 }
  0xe3   :  { %v1291_v32 = vadd.f32 %v1290_v20, %v1278_v28 }
  0xe7   :  { %v1303_v22 = vpop.f32.mrf.mxu2 }
  0xe8   :  { %v1279_v23 = vpop.f32.mrf.mxu0  ;;  %v1304_v55 = vadd.f32 %v1303_v22, %v1291_v32 }
  0xea   :  { %v1292_v25 = vpop.f32.mrf.mxu1 }
  0xed   :  { %v1316_v30 = vpop.f32.mrf.mxu3 }
  0xee   :  { %v1317_v26 = vadd.f32 %v1316_v30, %v1304_v55 }
  0xef   :  { %v1305_v31 = vpop.f32.mrf.mxu2 }
  0xf5   :  { %v1318_v33 = vpop.f32.mrf.mxu3 }
 0x100   :  { %v1329_v10 = vpop.f32.mrf.mxu0 }
 0x101   :  { %v1330_v35 = vadd.f32 %v1329_v10, %v1317_v26 }
 0x102   :  { %v1342_v36 = vpop.f32.mrf.mxu1 }
 0x103   :  { %v1343_v37 = vadd.f32 %v1342_v36, %v1330_v35 }
 0x105   :  { %v1438_v3 = vmul.f32 0.5, %v1343_v37 }
 0x107   :  { %2663 = vtanh.f32 %v1438_v3  ;;  %v1355_v39 = vpop.f32.mrf.mxu2 }
 0x108   :  { %v1331_v40 = vpop.f32.mrf.mxu0 }
 0x10a   :  { %v1344_v34 = vpop.f32.mrf.mxu1 }
 0x10d   :  { %v2664_v42 = vpop.eup %2663  ;;  %v1368_v44 = vpop.f32.mrf.mxu3 }
 0x10e   :  { %v1444_v43 = vadd.f32 1.0, %v2664_v42  ;;  %v1369_v61 = vadd.f32 %v1368_v44, %v1355_v39 }
 0x10f   :  { %v1357_v46 = vpop.f32.mrf.mxu2 }
 0x110   :  { %v1447_v47 = vmul.f32 0.5, %v1444_v43 }
 0x112   :  { %v1450_v48 = vpack.c.bf16 %v1447_v47, %v1447_v47 }
 0x114   :  { %1665 = vmatmul.bf16.vlgmr.msrb.gmra.mxu2 %v1450_v48 }
 0x115   :  { %v1370_v50 = vpop.f32.mrf.mxu3 }
 0x120   :  { %v1381_v52 = vpop.f32.mrf.mxu0 }
 0x121   :  { %v1382_v0 = vadd.f32 %v1381_v52, %v1369_v61 }
 0x122   :  { %v1394_v53 = vpop.f32.mrf.mxu1 }
 0x123   :  { %v1395_v1 = vadd.f32 %v1394_v53, %v1382_v0 }
 0x127   :  { %v1407_v56 = vpop.f32.mrf.mxu2 }
 0x128   :  { %v1383_v58 = vpop.f32.mrf.mxu0  ;;  %v1408_v5 = vadd.f32 %v1407_v56, %v1395_v1 }
 0x12a   :  { %v1396_v59 = vpop.f32.mrf.mxu1 }
 0x12d   :  { %v1420_v62 = vpop.f32.mrf.mxu3 }
 0x12e   :  { %v1421_v29 = vadd.f32 %v1420_v62, %v1408_v5 }
 0x12f   :  { %v1409_v63 = vpop.f32.mrf.mxu2 }
 0x135   :  { %v1422_v4 = vpop.f32.mrf.mxu3 }
 0x140   :  { %v1433_v6 = vpop.f32.mrf.mxu0 }
 0x141   :  { %v1434_v7 = vadd.f32 %v1433_v6, %v1421_v29 }
 0x143   :  { %v1439_v8 = vmul.f32 0.5, %v1434_v7 }
 0x145   :  { %2665 = vtanh.f32 %v1439_v8 }
 0x148   :  { %v1435_v9 = vpop.f32.mrf.mxu0 }
 0x14b   :  { %v2666_v11 = vpop.eup %2665 }
 0x14c   :  { %v1445_v12 = vadd.f32 1.0, %v2666_v11 }
 0x14e   :  { %v1448_v13 = vmul.f32 0.5, %v1445_v12 }
 0x150   :  { %v1451_v2 = vpack.c.bf16 %v1448_v13, %v1448_v13 }
 0x152   :  { %1678 = vmatmul.bf16.vlgmr.msrb.gmra.mxu3 %v1451_v2 }
 0x156   :  { %v1653_v14 = vpop.f32.mrf.mxu1 }
 0x15e   :  { %v1655_v15 = vpop.f32.mrf.mxu1 }
 0x197   :  { %v1666_v16 = vpop.f32.mrf.mxu2 }
 0x198   :  { %v1667_v18 = vadd.f32 %v1666_v16, %v1653_v14 }
 0x19f   :  { %v1668_v17 = vpop.f32.mrf.mxu2 }
 0x1d5   :  { %v1679_v19 = vpop.f32.mrf.mxu3 }
 0x1d6   :  { %v1680_v20 = vadd.f32 %v1679_v19, %v1667_v18 }
 0x1d8   :  { %1683 = vst [vmem:[#allocation2] sm:$0xff] %v1680_v20 }
 0x1d9   :  { %1694 = dma.vmem_to_hbm [thread:$0]  %s1690_s19, 128, %s1692_s22, [#allocation3]  }
 0x1dd   :  { %v1681_v21 = vpop.f32.mrf.mxu3 }
 0x1de   :  { %2691 = dma.done.wait [#allocation3], 128  }
 0x1df   :  { %2692 = vsyncadd [#allocation3], 4294967168 }
 0x1e0   :  { %1699 = vsyncpa [#allocation3], 1 }

</bundles_post_ra>
